<compile_context>
chip_gen: v7x
topology: tpu7x:2x2x1
jax: 0.10.0
libtpu: 0.0.40
codegen_flags: <defaults>
</compile_context>

<pallas_src>
import functools

import jax
import jax.numpy as jnp
from jax.experimental import pallas as pl
from jax.experimental.pallas import tpu as pltpu


def _logreg_kernel(w_ref, b_ref, x_ref, o_ref):
    # w_ref: [p] (SMEM)    b_ref: [1] (SMEM)
    # x_ref: [p, R, 128] (VMEM) -- batch spread over sublanes (R) and lanes.
    # o_ref: [R, 128]    (VMEM) -- fully packed vregs, lane-dense stores.
    p = x_ref.shape[0]
    z = x_ref[0] * w_ref[0] + b_ref[0]      # scalar broadcast from SMEM
    for j in range(1, p):                   # p is tiny & static -> unrolled VPU FMAs
        z = z + x_ref[j] * w_ref[j]
    # sigmoid(z) = 0.5 * tanh(z/2) + 0.5 : one EUP op, exact (no approx recip).
    o_ref[...] = (0.5 * jnp.tanh(0.5 * z) + 0.5).astype(o_ref.dtype)


def _round_up(a, b):
    return pl.cdiv(a, b) * b


@functools.partial(jax.jit, static_argnames=("block_n",))
def logistic_regression(x, weight, bias, *, block_n=262144):
    """x: [N, p] f32, weight: [1, p] f32, bias: [1] f32 -> sigmoid(x@w.T+b): [N, 1]."""
    n, p = x.shape

    # --- static tile selection -------------------------------------------------
    # Clamp the tile so (x double-buffer + out double-buffer) stays far below the
    # default scoped VMEM on every generation (incl. v7x's 64 MiB physical).
    block_n = max(1024, min(int(block_n), 524288))
    n_pad = _round_up(n, 128)
    if n_pad > block_n:
        # Multi-tile: tile must be a whole number of (8, 128) vregs.
        tn = (block_n // 1024) * 1024
        n_pad = _round_up(n, tn)
    else:
        # Single tile: block equals the full (lane-padded) array.
        tn = n_pad
    rows, trows = n_pad // 128, tn // 128

    # --- layout plumbing (fused by XLA under jit) -------------------------------
    xt = jnp.asarray(x, jnp.float32).T                       # [p, N]
    if n_pad != n:
        xt = jnp.pad(xt, ((0, 0), (0, n_pad - n)))           # zero-pad batch
    x_blocks = xt.reshape(p, rows, 128)                      # [p, rows, 128]

    w1d = jnp.asarray(weight, jnp.float32).reshape(p)        # -> SMEM scalars
    b1d = jnp.asarray(bias, jnp.float32).reshape(1)

    out = pl.pallas_call(
        _logreg_kernel,
        out_shape=jax.ShapeDtypeStruct((rows, 128), jnp.float32),
        grid=(n_pad // tn,),
        in_specs=[
            pl.BlockSpec(memory_space=pltpu.MemorySpace.SMEM),   # weight [p]
            pl.BlockSpec(memory_space=pltpu.MemorySpace.SMEM),   # bias   [1]
            pl.BlockSpec((p, trows, 128), lambda i: (0, i, 0)),  # x tile
        ],
        out_specs=pl.BlockSpec((trows, 128), lambda i: (i, 0)),  # aligned out tile
        compiler_params=pltpu.CompilerParams(
            dimension_semantics=("parallel",),
        ),
    )(w1d, b1d, x_blocks)

    # Back to the nn.Linear(p, 1) convention: [N, 1].
    return out.reshape(n_pad)[:n].reshape(n, 1)


if __name__ == "__main__":
    key = jax.random.PRNGKey(0)
    k_x, k_w, k_b = jax.random.split(key, 3)

    # Mirrors the surrounding script: samples from two 100-dim Gaussians,
    # transposed -> x has shape (100, 2), so LogisticRegression(p=2).
    N, P = 100, 2
    x = jax.random.normal(k_x, (N, P), dtype=jnp.float32) + jnp.array(
        [[1.0, 3.0]], dtype=jnp.float32
    )

    # nn.Linear(p, 1) default init: U(-1/sqrt(p), 1/sqrt(p)) for weight & bias.
    bound = 1.0 / jnp.sqrt(jnp.float32(P))
    weight = jax.random.uniform(k_w, (1, P), jnp.float32, -bound, bound)
    bias = jax.random.uniform(k_b, (1,), jnp.float32, -bound, bound)

    out = jax.block_until_ready(logistic_regression(x, weight, bias))
    ref = jax.nn.sigmoid(x @ weight.T + bias)
    assert out.shape == (N, 1), out.shape
    assert jnp.allclose(out, ref, atol=1e-4), "mismatch vs reference"

    # Multi-tile (gridded) path: N=4096, block_n=1024 -> 4 grid steps of
    # (2, 8, 128) input blocks / (8, 128) output blocks (fully aligned).
    N2 = 4096
    x2 = jax.random.normal(jax.random.PRNGKey(1), (N2, P), dtype=jnp.float32)
    out2 = jax.block_until_ready(logistic_regression(x2, weight, bias, block_n=1024))
    ref2 = jax.nn.sigmoid(x2 @ weight.T + bias)
    assert out2.shape == (N2, 1), out2.shape
    assert jnp.allclose(out2, ref2, atol=1e-4), "mismatch vs reference (tiled)"

    # Ragged batch that needs lane padding on the multi-tile path.
    N3 = 3000
    x3 = jax.random.normal(jax.random.PRNGKey(2), (N3, P), dtype=jnp.float32)
    out3 = jax.block_until_ready(logistic_regression(x3, weight, bias, block_n=1024))
    ref3 = jax.nn.sigmoid(x3 @ weight.T + bias)
    assert out3.shape == (N3, 1), out3.shape
    assert jnp.allclose(out3, ref3, atol=1e-4), "mismatch vs reference (ragged)"

    print("KERNEL_OK")
</pallas_src>

<mosaic_0001>
module attributes {stable_mosaic.version = 11 : i64} {
  func.func @_logreg_kernel(%arg0: i32, %arg1: memref<2xf32, #tpu.memory_space<smem>>, %arg2: memref<1xf32, #tpu.memory_space<smem>>, %arg3: memref<2x1x128xf32, #tpu.memory_space<vmem>>, %arg4: memref<1x128xf32, #tpu.memory_space<vmem>>) attributes {dimension_semantics = [#tpu.dimension_semantics<parallel>], iteration_bounds = array<i64: 1>, scalar_prefetch = 0 : i64, scratch_operands = 0 : i64, tpu.core_type = #tpu.core_type<tc>, window_params = [{transform_indices = @transform_0, window_bounds = array<i64: 2>}, {transform_indices = @transform_1, window_bounds = array<i64: 1>}, {transform_indices = @transform_2, window_bounds = array<i64: 2, 1, 128>}, {transform_indices = @transform_3, window_bounds = array<i64: 1, 128>}]} {
    %c0 = arith.constant 0 : index
    %c0_0 = arith.constant 0 : index
    %c0_1 = arith.constant 0 : index
    %0 = vector.load %arg3[%c0, %c0_0, %c0_1] : memref<2x1x128xf32, #tpu.memory_space<vmem>>, vector<1x1x128xf32>
    %1 = vector.shape_cast %0 : vector<1x1x128xf32> to vector<1x128xf32>
    %c0_2 = arith.constant 0 : index
    %2 = memref.load %arg1[%c0_2] : memref<2xf32, #tpu.memory_space<smem>>
    %3 = vector.broadcast %2 : f32 to vector<1x128xf32>
    %4 = arith.mulf %1, %3 : vector<1x128xf32>
    %c0_3 = arith.constant 0 : index
    %5 = memref.load %arg2[%c0_3] : memref<1xf32, #tpu.memory_space<smem>>
    %6 = vector.broadcast %5 : f32 to vector<1x128xf32>
    %7 = arith.addf %4, %6 : vector<1x128xf32>
    %c1 = arith.constant 1 : index
    %c0_4 = arith.constant 0 : index
    %c0_5 = arith.constant 0 : index
    %8 = vector.load %arg3[%c1, %c0_4, %c0_5] : memref<2x1x128xf32, #tpu.memory_space<vmem>>, vector<1x1x128xf32>
    %9 = vector.shape_cast %8 : vector<1x1x128xf32> to vector<1x128xf32>
    %c1_6 = arith.constant 1 : index
    %10 = memref.load %arg1[%c1_6] : memref<2xf32, #tpu.memory_space<smem>>
    %11 = vector.broadcast %10 : f32 to vector<1x128xf32>
    %12 = arith.mulf %9, %11 : vector<1x128xf32>
    %13 = arith.addf %7, %12 : vector<1x128xf32>
    %cst = arith.constant 5.000000e-01 : f32
    %14 = vector.broadcast %cst : f32 to vector<1x128xf32>
    %15 = arith.mulf %14, %13 : vector<1x128xf32>
    %16 = math.tanh %15 : vector<1x128xf32>
    %cst_7 = arith.constant 5.000000e-01 : f32
    %17 = vector.broadcast %cst_7 : f32 to vector<1x128xf32>
    %18 = arith.mulf %17, %16 : vector<1x128xf32>
    %cst_8 = arith.constant 5.000000e-01 : f32
    %19 = vector.broadcast %cst_8 : f32 to vector<1x128xf32>
    %20 = arith.addf %18, %19 : vector<1x128xf32>
    %c0_9 = arith.constant 0 : index
    %c0_10 = arith.constant 0 : index
    %21 = vector.load %arg4[%c0_9, %c0_10] : memref<1x128xf32, #tpu.memory_space<vmem>>, vector<1x128xf32>
    tpu.vector_store %arg4[%c0_9, %c0_10], %20 {strides = array<i32>} : memref<1x128xf32, #tpu.memory_space<vmem>>, vector<1x128xf32>,
    return
  }
  func.func @transform_0(%arg0: i32) -> i32 {
    %c0_i32 = arith.constant 0 : i32
    %c0_i32_0 = arith.constant 0 : i32
    return %c0_i32 : i32
  }
  func.func @transform_1(%arg0: i32) -> i32 {
    %c0_i32 = arith.constant 0 : i32
    %c0_i32_0 = arith.constant 0 : i32
    return %c0_i32 : i32
  }
  func.func @transform_2(%arg0: i32) -> (i32, i32, i32) {
    %c0_i32 = arith.constant 0 : i32
    %c0_i32_0 = arith.constant 0 : i32
    %c0_i32_1 = arith.constant 0 : i32
    return %c0_i32, %arg0, %c0_i32_0 : i32, i32, i32
  }
  func.func @transform_3(%arg0: i32) -> (i32, i32) {
    %c0_i32 = arith.constant 0 : i32
    %c0_i32_0 = arith.constant 0 : i32
    return %arg0, %c0_i32 : i32, i32
  }
}

</mosaic_0001>

<bundles_post_ra>
// kernel: logistic_regression.1
= control target key start
LH: loop header
LB: loop body
LE: loop exit
PB: predicated region body
PF: predicated region fallthrough
CT: control target
= control target key end

     0   :  { %9 = vsyncpa [#allocation4], 0  ;;  %s106_s0 = inlined_call_operand.vmem [shape: f32[2], index: 0, kind: input, shape index: {}]   ;;  %s107_s1 = inlined_call_operand.<no memory space> [shape: f32[1], index: 1, kind: input, shape index: {}]   ;;  %s108_s2 = inlined_call_operand.vmem [shape: f32[2,1,128], index: 2, kind: input, shape index: {}]   ;;  %s109_s3 = inlined_call_operand.vmem [shape: f32[1,128], index: 3, kind: output, shape index: {}]  }
   0x1   :  { %s16_s14 = sshll.u32 %s106_s0, 4  ;;  %s17_s14 = int_to_ptr.vmem [resolvable:$true] %s16_s14 }
   0x2   :  { %s56_s15 = scalar_lea.vmem %s17_s14, 16  ;;  %p61_p1 = scmp.lt.s32.totalorder %s17_s14, %s17_s14 }
   0x3   :  { %p57_p0 = scmp.ne.s32.totalorder %s17_s14, %s56_s15  ;;  %p62_p2 = scmp.lt.s32.totalorder %s56_s15, %s56_s15 }
   0x5   :  { %p63_p3 = por %p62_p2, %p61_p1 }
   0x7   :  { %p64_p4 = pnand %p63_p3, %p57_p0 }
   0x9   :  { %67 = shalt.err (!%p64_p4)
}
   0xa   :  { %s70_s16 = smov [#allocation3]  }
   0xb   :  { %19 = dma.vmem_to_smem %s17_s14, 16, %s70_s16, [#allocation4]  }
   0xc   :  { %68 = dma.done.wait [#allocation4], 16  }
   0xd   :  { %69 = vsyncadd [#allocation4], 4294967280 }
   0xe   :  { %27 = sfence }
   0xf   :  { %s29_s17 = sld [smem:[#allocation3]]  ;;  %s52_s18 = sld [smem:[#allocation3 + $0x1]]  ;;  %v28_v0 = vld [vmem:[%s108_s2] sm:$0x1]  ;;  %v51_v1 = vld [vmem:[%s108_s2 + $0x1] sm:$0x1]  ;;  %v33_v3 = vstv %s107_s1 }
  0x15   :  { %v30_v2 = vstv %s29_s17  ;;  %v38_v5 = vstv %s52_s18 }
  0x16   :  { %v31_v4 = vmul.f32 %v30_v2, %v28_v0  ;;  %v39_v6 = vmul.f32 %v51_v1, %v38_v5 }
  0x18   :  { %v34_v7 = vadd.f32 %v33_v3, %v31_v4 }
  0x1a   :  { %v40_v8 = vadd.f32 %v39_v6, %v34_v7 }
  0x1c   :  { %v41_v9 = vmul.f32 0.5, %v40_v8 }
  0x1e   :  { %54 = vtanh.f32 %v41_v9 }
  0x28   :  { %v55_v10 = vpop.eup %54 }
  0x29   :  { %v43_v11 = vmul.f32 0.5, %v55_v10 }
  0x2b   :  { %v44_v12 = vadd.f32 0.5, %v43_v11 }
  0x2d   :  { %45 = vst [vmem:[%s109_s3] sm:$0x1] %v44_v12 }
  0x2e   :  { %50 = vsyncpa [#allocation4], 1 }

</bundles_post_ra>
